<compile_context>
chip_gen: v7x
topology: tpu7x:2x2x1
jax: 0.10.0
libtpu: 0.0.40
codegen_flags: <defaults>
</compile_context>

<pallas_src>
import functools
import math

import jax
import jax.numpy as jnp
from jax import lax
from jax.experimental import pallas as pl
from jax.experimental.pallas import tpu as pltpu

INV_SQRT2 = 1.0 / math.sqrt(2.0)
LN_EPS = 1e-5


def _round_up(x, m):
    return ((x + m - 1) // m) * m


def _vmem_limit_bytes():
    # v5e/v6e: 128 MiB physical VMEM, v7x: 64 MiB -> derive per-chip with ~25% headroom.
    default = 48 * 1024 * 1024
    try:
        cap = getattr(pltpu.get_tpu_info(), "vmem_capacity_bytes", None)
        return int(cap * 3 // 4) if cap else default
    except Exception:
        return default


def _compiler_params(dims):
    return pltpu.CompilerParams(dimension_semantics=dims,
                                vmem_limit_bytes=_vmem_limit_bytes())


def _choose_block_rows(rows, target=256):
    """Row tile: multiple of 8, <= target, and >= 2 blocks when rows allow (megacore)."""
    bm = min(target, _round_up(max(rows, 1), 8))
    if rows > 8 and _round_up(rows, bm) // bm < 2:
        bm = _round_up(pl.cdiv(rows, 2), 8)
    return bm


def _gelu_exact(x):
    # torch.nn.GELU() default (approximate='none')
    return 0.5 * x * (1.0 + lax.erf(x * INV_SQRT2))


def _layer_norm_rows(x, gamma, beta):
    mu = jnp.mean(x, axis=-1, keepdims=True)
    xc = x - mu
    var = jnp.mean(xc * xc, axis=-1, keepdims=True)
    return xc * lax.rsqrt(var + LN_EPS) * gamma + beta


# ---------------------------------------------------------------------------
# Kernel 1: k == 0 aggregation   h[0] = dist_masks[:, 0] @ dense_features
# ---------------------------------------------------------------------------
def _aggregate_k0_kernel(dist_ref, dense_ref, o_ref):
    # bf16 MXU operands (mask is 0/1 -> exact in bf16), f32 accumulation.
    m = dist_ref[0, 0].astype(jnp.bfloat16)          # (tm, n_max)
    d = dense_ref[0].astype(jnp.bfloat16)            # (n_max, F)
    o_ref[0] = jnp.dot(m, d, preferred_element_type=jnp.float32)


def _agg_row_tile(n_max):
    # Tile mask rows for large n_max so double-buffered blocks fit v7x's 64 MiB VMEM.
    if n_max <= 512 or n_max % 8 != 0:
        return n_max
    for tm in (512, 256, 128, 64, 32, 16, 8):
        if n_max % tm == 0:
            return tm
    return n_max


def _aggregate_k0(dist_masks, dense):
    """Only the k == 0 slab of dist_masks is ever DMA'd (index_map selects it)."""
    B, K, n_max, _ = dist_masks.shape
    F = dense.shape[-1]
    tm = _agg_row_tile(n_max)
    return pl.pallas_call(
        _aggregate_k0_kernel,
        out_shape=jax.ShapeDtypeStruct((B, n_max, F), jnp.float32),
        grid=(B, n_max // tm),
        in_specs=[
            pl.BlockSpec((1, 1, tm, n_max), lambda b, i: (b, 0, i, 0)),
            pl.BlockSpec((1, n_max, F), lambda b, i: (b, 0, 0)),   # resident across i
        ],
        out_specs=pl.BlockSpec((1, tm, F), lambda b, i: (b, i, 0)),
        compiler_params=_compiler_params(("parallel", "parallel")),
    )(dist_masks, dense)


# ---------------------------------------------------------------------------
# Kernel 2: fused  LN1+MLP1(+res)  ||  LN2 + LSTM step0 + GELU + full-GLU + add
# ---------------------------------------------------------------------------
def _fused_kernel(x_ref, ln1g_ref, ln1b_ref, w1_ref, b1_ref, w2_ref, b2_ref,
                  ln2g_ref, ln2b_ref, wih_ref, bih_ref,
                  wm1_ref, bm1_ref, wm2_ref, bm2_ref, o_ref, *, vp):
    x = x_ref[...]                                               # (bm, F) f32

    # ---- MLP1 residual branch: LN -> linear1 -> GELU -> linear2 -> + x ----
    xn1 = _layer_norm_rows(x, ln1g_ref[...], ln1b_ref[...])
    t = jnp.dot(xn1.astype(jnp.bfloat16), w1_ref[...],
                preferred_element_type=jnp.float32) + b1_ref[...]
    t = _gelu_exact(t)
    # TODO(synk): dropout with drop_rate=0 is the identity; training-mode dropout would
    # need pltpu.prng_* in-kernel and is omitted.
    x_skip = jnp.dot(t.astype(jnp.bfloat16), w2_ref[...],
                     preferred_element_type=jnp.float32) + b2_ref[...] + x

    # ---- LN2 + LSTM time-step 0 (h0 = c0 = 0 -> no W_hh term, no forget gate) ----
    xn2 = _layer_norm_rows(x, ln2g_ref[...], ln2b_ref[...])
    gates = jnp.dot(xn2.astype(jnp.bfloat16), wih_ref[...],
                    preferred_element_type=jnp.float32) + bih_ref[...]   # (bm, 3*vp)
    i_g = jax.nn.sigmoid(gates[:, 0 * vp:1 * vp])
    g_g = jnp.tanh(gates[:, 1 * vp:2 * vp])
    o_g = jax.nn.sigmoid(gates[:, 2 * vp:3 * vp])
    h_l = o_g * jnp.tanh(i_g * g_g)                  # (bm, vp); padded lanes stay 0

    # ---- MLP2 full-GLU: GELU -> linear1 * sigmoid(linear2), then final add ----
    g = _gelu_exact(h_l).astype(jnp.bfloat16)
    y1 = jnp.dot(g, wm1_ref[...], preferred_element_type=jnp.float32) + bm1_ref[...]
    y2 = jnp.dot(g, wm2_ref[...], preferred_element_type=jnp.float32) + bm2_ref[...]
    o_ref[...] = (y1 * jax.nn.sigmoid(y2) + x_skip).astype(o_ref.dtype)


def _fused_forward(h0, packed):
    N, F = h0.shape
    Fe = packed["mlp1_w1"].shape[1]
    vp = packed["wm1"].shape[0]
    bm = _choose_block_rows(N)
    rows_pad = _round_up(N, bm)
    if rows_pad != N:
        h0 = jnp.pad(h0, ((0, rows_pad - N), (0, 0)))

    const = lambda i: (0, 0)
    cost = pl.CostEstimate(
        flops=2 * rows_pad * (F * Fe + Fe * F + F * 3 * vp + 2 * vp * F),
        transcendentals=rows_pad * (Fe + 5 * vp + F),
        bytes_accessed=rows_pad * F * 8
        + 2 * (F * Fe + Fe * F + F * 3 * vp + 2 * vp * F),
    )
    out = pl.pallas_call(
        functools.partial(_fused_kernel, vp=vp),
        out_shape=jax.ShapeDtypeStruct((rows_pad, F), jnp.float32),
        grid=(rows_pad // bm,),
        in_specs=[
            pl.BlockSpec((bm, F), lambda i: (i, 0)),                       # h0 row tile
            pl.BlockSpec((1, F), const), pl.BlockSpec((1, F), const),      # LN1 g/b
            pl.BlockSpec((F, Fe), const), pl.BlockSpec((1, Fe), const),    # W1 / b1
            pl.BlockSpec((Fe, F), const), pl.BlockSpec((1, F), const),     # W2 / b2
            pl.BlockSpec((1, F), const), pl.BlockSpec((1, F), const),      # LN2 g/b
            pl.BlockSpec((F, 3 * vp), const),                              # W_ih [i|g|o]
            pl.BlockSpec((1, 3 * vp), const),                              # bias [i|g|o]
            pl.BlockSpec((vp, F), const), pl.BlockSpec((1, F), const),     # Wm1 / bm1
            pl.BlockSpec((vp, F), const), pl.BlockSpec((1, F), const),     # Wm2 / bm2
        ],
        out_specs=pl.BlockSpec((bm, F), lambda i: (i, 0)),
        compiler_params=_compiler_params(("parallel",)),
        cost_estimate=cost,
    )(h0,
      packed["ln1_g"], packed["ln1_b"],
      packed["mlp1_w1"], packed["mlp1_b1"],
      packed["mlp1_w2"], packed["mlp1_b2"],
      packed["ln2_g"], packed["ln2_b"],
      packed["w_ih"], packed["b_ih"],
      packed["wm1"], packed["bm1"],
      packed["wm2"], packed["bm2"])
    return out[:N]


# ---------------------------------------------------------------------------
# One-time parameter packing (hoisted out of the forward, per review)
# ---------------------------------------------------------------------------
def pack_params(params):
    F = params["mlp1_ln_g"].shape[0]
    Fe = params["mlp1_w1"].shape[1]
    V = params["lstm_w_hh"].shape[1]
    H = params["mlp2_w1"].shape[1]
    vp = _round_up(V, 128)
    bf = jnp.bfloat16
    f32 = jnp.float32

    w_ih = params["lstm_w_ih"]                          # (4V, F), gate rows [i, f, g, o]
    bias = params["lstm_b_ih"] + params["lstm_b_hh"]    # (4V,)

    def gate_w(idx):    # (V, F) -> (F, vp), zero-padded hidden lanes
        return jnp.pad(w_ih[idx * V:(idx + 1) * V].T, ((0, 0), (0, vp - V)))

    def gate_b(idx):
        return jnp.pad(bias[idx * V:(idx + 1) * V], (0, vp - V))

    # Forget gate (idx 1) dropped: with c0 == 0 it never affects the k == 0 output.
    w_ih_p = jnp.concatenate([gate_w(0), gate_w(2), gate_w(3)], axis=1)   # (F, 3*vp)
    b_ih_p = jnp.concatenate([gate_b(0), gate_b(2), gate_b(3)]).reshape(1, 3 * vp)

    def pad_rows(w):    # (V, H) -> (vp, H)
        return jnp.pad(w, ((0, vp - V), (0, 0)))

    return {
        "ln1_g": params["mlp1_ln_g"].reshape(1, F).astype(f32),
        "ln1_b": params["mlp1_ln_b"].reshape(1, F).astype(f32),
        "mlp1_w1": params["mlp1_w1"].astype(bf),
        "mlp1_b1": params["mlp1_b1"].reshape(1, Fe).astype(f32),
        "mlp1_w2": params["mlp1_w2"].astype(bf),
        "mlp1_b2": params["mlp1_b2"].reshape(1, F).astype(f32),
        "ln2_g": params["ln2_g"].reshape(1, F).astype(f32),
        "ln2_b": params["ln2_b"].reshape(1, F).astype(f32),
        "w_ih": w_ih_p.astype(bf),
        "b_ih": b_ih_p.astype(f32),
        "wm1": pad_rows(params["mlp2_w1"]).astype(bf),
        "bm1": params["mlp2_b1"].reshape(1, H).astype(f32),
        "wm2": pad_rows(params["mlp2_w2"]).astype(bf),
        "bm2": params["mlp2_b2"].reshape(1, H).astype(f32),
    }


# ---------------------------------------------------------------------------
# Full LSTMLayer forward (exact: module output only consumes time-step k == 0)
# ---------------------------------------------------------------------------
@jax.jit
def lstm_layer_forward(node_features, dist_masks, graph_labels, packed):
    del graph_labels
    # TODO(synk): general ragged to_dense_batch (variable nodes per graph) is
    # data-dependent; here every graph has n_max nodes so it is a reshape.
    B, K, n_max, _ = dist_masks.shape
    N, F = node_features.shape
    dense = node_features.reshape(B, n_max, F).astype(jnp.float32)
    h0 = _aggregate_k0(dist_masks.astype(jnp.float32), dense).reshape(N, F)
    return _fused_forward(h0, packed)


# ---------------------------------------------------------------------------
# Pure-JAX f32 reference (mirrors the PyTorch module op-for-op, full K sequence)
# ---------------------------------------------------------------------------
def _reference_forward(node_features, dist_masks, graph_labels, p):
    del graph_labels
    B, K, n_max, _ = dist_masks.shape
    N, F = node_features.shape
    V = p["lstm_w_hh"].shape[1]

    dense = node_features.reshape(B, n_max, F).astype(jnp.float32)
    agg = jnp.einsum("bkij,bjf->kbif", dist_masks.astype(jnp.float32), dense)
    h = agg.reshape(K, N, F)

    def ln(x, g, b):
        mu = jnp.mean(x, -1, keepdims=True)
        var = jnp.mean((x - mu) ** 2, -1, keepdims=True)
        return (x - mu) / jnp.sqrt(var + LN_EPS) * g + b

    x1 = ln(h, p["mlp1_ln_g"], p["mlp1_ln_b"])
    x1 = _gelu_exact(x1 @ p["mlp1_w1"] + p["mlp1_b1"])
    x1 = x1 @ p["mlp1_w2"] + p["mlp1_b2"]
    x_skip = x1 + h

    x = jnp.transpose(h, (1, 0, 2))                     # (N, K, F), batch_first
    x = ln(x, p["ln2_g"], p["ln2_b"])
    w_ih, w_hh = p["lstm_w_ih"], p["lstm_w_hh"]
    bias = p["lstm_b_ih"] + p["lstm_b_hh"]
    h_t = jnp.zeros((N, V), jnp.float32)
    c_t = jnp.zeros((N, V), jnp.float32)
    outs = []
    for k in range(K):
        gates = x[:, k, :] @ w_ih.T + h_t @ w_hh.T + bias
        i_g = jax.nn.sigmoid(gates[:, 0:V])
        f_g = jax.nn.sigmoid(gates[:, V:2 * V])
        g_g = jnp.tanh(gates[:, 2 * V:3 * V])
        o_g = jax.nn.sigmoid(gates[:, 3 * V:4 * V])
        c_t = f_g * c_t + i_g * g_g
        h_t = o_g * jnp.tanh(c_t)
        outs.append(h_t)
    lstm_out = jnp.stack(outs, axis=1)                  # (N, K, V)

    g2 = _gelu_exact(lstm_out)
    y = (g2 @ p["mlp2_w1"] + p["mlp2_b1"]) * jax.nn.sigmoid(g2 @ p["mlp2_w2"] + p["mlp2_b2"])
    y = jnp.transpose(y, (1, 0, 2))                     # (K, N, dim_hidden)
    return y[0] + x_skip[0]


if __name__ == "__main__":
    B, n_per, K = 2, 8, 4
    dim_hidden, dim_v, expand = 32, 32, 1
    N = B * n_per
    Fe = expand * dim_hidden

    key = jax.random.PRNGKey(0)
    keys = jax.random.split(key, 20)

    node_features = jax.random.normal(keys[0], (N, dim_hidden), jnp.float32)
    dist_masks = (jax.random.uniform(keys[1], (B, K, n_per, n_per)) < 0.5).astype(jnp.float32)
    graph_labels = jnp.repeat(jnp.arange(B, dtype=jnp.int32), n_per)

    def uni(k, shape, bound):
        return jax.random.uniform(k, shape, jnp.float32, -bound, bound)

    bh = 1.0 / math.sqrt(dim_hidden)
    be = 1.0 / math.sqrt(Fe)
    bv = 1.0 / math.sqrt(dim_v)

    params = {
        # MLP1 (linear weights stored transposed, i.e. torch weight.T, for x @ W)
        "mlp1_ln_g": jax.random.uniform(keys[2], (dim_hidden,), jnp.float32, 0.5, 1.5),
        "mlp1_ln_b": uni(keys[3], (dim_hidden,), 0.1),
        "mlp1_w1": uni(keys[4], (dim_hidden, Fe), bh),
        "mlp1_b1": uni(keys[5], (Fe,), bh),
        "mlp1_w2": uni(keys[6], (Fe, dim_hidden), be),
        "mlp1_b2": uni(keys[7], (dim_hidden,), be),
        # pre-LSTM LayerNorm
        "ln2_g": jax.random.uniform(keys[8], (dim_hidden,), jnp.float32, 0.5, 1.5),
        "ln2_b": uni(keys[9], (dim_hidden,), 0.1),
        # LSTM (PyTorch layout: (4*dim_v, in_features), gate order i, f, g, o)
        "lstm_w_ih": uni(keys[10], (4 * dim_v, dim_hidden), bv),
        "lstm_w_hh": uni(keys[11], (4 * dim_v, dim_v), bv),
        "lstm_b_ih": uni(keys[12], (4 * dim_v,), bv),
        "lstm_b_hh": uni(keys[13], (4 * dim_v,), bv),
        # MLP2 full-glu (weights transposed for x @ W)
        "mlp2_w1": uni(keys[14], (dim_v, dim_hidden), bv),
        "mlp2_b1": uni(keys[15], (dim_hidden,), bv),
        "mlp2_w2": uni(keys[16], (dim_v, dim_hidden), bv),
        "mlp2_b2": uni(keys[17], (dim_hidden,), bv),
    }

    # One-time packing (pad/transpose/bf16-cast) -- not redone per forward call.
    packed = jax.tree_util.tree_map(jnp.asarray, pack_params(params))

    out = lstm_layer_forward(node_features, dist_masks, graph_labels, packed)
    out = jax.block_until_ready(out)

    ref = _reference_forward(node_features, dist_masks, graph_labels, params)

    assert out.shape == (N, dim_hidden)
    assert bool(jnp.all(jnp.isfinite(out)))
    max_err = float(jnp.max(jnp.abs(out - ref)))
    # bf16 MXU operands (f32 accumulation) throughout -> relaxed tolerance vs f32 ref.
    assert jnp.allclose(out, ref, atol=5e-2, rtol=5e-2), \
        f"mismatch vs reference, max err {max_err}"

    print("KERNEL_OK")
</pallas_src>

<mosaic_0001>
module attributes {stable_mosaic.version = 11 : i64} {
  func.func @_aggregate_k0_kernel(%arg0: i32, %arg1: i32, %arg2: memref<1x1x8x8xf32, #tpu.memory_space<vmem>>, %arg3: memref<1x8x32xf32, #tpu.memory_space<vmem>>, %arg4: memref<1x8x32xf32, #tpu.memory_space<vmem>>) attributes {dimension_semantics = [#tpu.dimension_semantics<parallel>, #tpu.dimension_semantics<parallel>], iteration_bounds = array<i64: 2, 1>, scalar_prefetch = 0 : i64, scratch_operands = 0 : i64, tpu.core_type = #tpu.core_type<tc>, window_params = [{transform_indices = @transform_0, window_bounds = array<i64: 1, 1, 8, 8>}, {transform_indices = @transform_1, window_bounds = array<i64: 1, 8, 32>}, {transform_indices = @transform_2, window_bounds = array<i64: 1, 8, 32>}]} {
    %c0 = arith.constant 0 : index
    %c0_0 = arith.constant 0 : index
    %c0_1 = arith.constant 0 : index
    %c0_2 = arith.constant 0 : index
    %0 = vector.load %arg2[%c0, %c0_0, %c0_1, %c0_2] : memref<1x1x8x8xf32, #tpu.memory_space<vmem>>, vector<1x1x8x8xf32>
    %1 = vector.shape_cast %0 : vector<1x1x8x8xf32> to vector<8x8xf32>
    %2 = arith.truncf %1 : vector<8x8xf32> to vector<8x8xbf16>
    %c0_3 = arith.constant 0 : index
    %c0_4 = arith.constant 0 : index
    %c0_5 = arith.constant 0 : index
    %3 = vector.load %arg3[%c0_3, %c0_4, %c0_5] : memref<1x8x32xf32, #tpu.memory_space<vmem>>, vector<1x8x32xf32>
    %4 = vector.shape_cast %3 : vector<1x8x32xf32> to vector<8x32xf32>
    %5 = arith.truncf %4 : vector<8x32xf32> to vector<8x32xbf16>
    %cst = arith.constant dense<0.000000e+00> : vector<8x32xf32>
    %6 = tpu.matmul %2, %5, %cst {dimension_numbers = #tpu.dot_dimension_numbers<[1], [0], [0], [1], [0, 0, 1, 1], [], []>} : vector<8x8xbf16>, vector<8x32xbf16>, vector<8x32xf32> -> vector<8x32xf32>
    %c0_6 = arith.constant 0 : index
    %c0_7 = arith.constant 0 : index
    %c0_8 = arith.constant 0 : index
    %7 = vector.load %arg4[%c0_6, %c0_7, %c0_8] : memref<1x8x32xf32, #tpu.memory_space<vmem>>, vector<1x8x32xf32>
    %8 = vector.shape_cast %7 : vector<1x8x32xf32> to vector<8x32xf32>
    %9 = vector.shape_cast %6 : vector<8x32xf32> to vector<1x8x32xf32>
    tpu.vector_store %arg4[%c0_6, %c0_7, %c0_8], %9 {strides = array<i32>} : memref<1x8x32xf32, #tpu.memory_space<vmem>>, vector<1x8x32xf32>,
    return
  }
  func.func @transform_0(%arg0: i32, %arg1: i32) -> (i32, i32, i32, i32) {
    %c0_i32 = arith.constant 0 : i32
    %c0_i32_0 = arith.constant 0 : i32
    %c0_i32_1 = arith.constant 0 : i32
    return %arg0, %c0_i32, %arg1, %c0_i32_0 : i32, i32, i32, i32
  }
  func.func @transform_1(%arg0: i32, %arg1: i32) -> (i32, i32, i32) {
    %c0_i32 = arith.constant 0 : i32
    %c0_i32_0 = arith.constant 0 : i32
    %c0_i32_1 = arith.constant 0 : i32
    return %arg0, %c0_i32, %c0_i32_0 : i32, i32, i32
  }
  func.func @transform_2(%arg0: i32, %arg1: i32) -> (i32, i32, i32) {
    %c0_i32 = arith.constant 0 : i32
    %c0_i32_0 = arith.constant 0 : i32
    return %arg0, %arg1, %c0_i32 : i32, i32, i32
  }
}

module attributes {stable_mosaic.version = 11 : i64} {
  func.func @_fused_kernel(%arg0: i32, %arg1: memref<8x32xf32, #tpu.memory_space<vmem>>, %arg2: memref<1x32xf32, #tpu.memory_space<vmem>>, %arg3: memref<1x32xf32, #tpu.memory_space<vmem>>, %arg4: memref<32x32xbf16, #tpu.memory_space<vmem>>, %arg5: memref<1x32xf32, #tpu.memory_space<vmem>>, %arg6: memref<32x32xbf16, #tpu.memory_space<vmem>>, %arg7: memref<1x32xf32, #tpu.memory_space<vmem>>, %arg8: memref<1x32xf32, #tpu.memory_space<vmem>>, %arg9: memref<1x32xf32, #tpu.memory_space<vmem>>, %arg10: memref<32x384xbf16, #tpu.memory_space<vmem>>, %arg11: memref<1x384xf32, #tpu.memory_space<vmem>>, %arg12: memref<128x32xbf16, #tpu.memory_space<vmem>>, %arg13: memref<1x32xf32, #tpu.memory_space<vmem>>, %arg14: memref<128x32xbf16, #tpu.memory_space<vmem>>, %arg15: memref<1x32xf32, #tpu.memory_space<vmem>>, %arg16: memref<8x32xf32, #tpu.memory_space<vmem>>) attributes {dimension_semantics = [#tpu.dimension_semantics<parallel>], iteration_bounds = array<i64: 2>, scalar_prefetch = 0 : i64, scratch_operands = 0 : i64, tpu.core_type = #tpu.core_type<tc>, window_params = [{transform_indices = @transform_0, window_bounds = array<i64: 8, 32>}, {pipeline_mode = #tpu.pipeline_mode<synchronous>, transform_indices = @transform_1, window_bounds = array<i64: 1, 32>}, {pipeline_mode = #tpu.pipeline_mode<synchronous>, transform_indices = @transform_2, window_bounds = array<i64: 1, 32>}, {pipeline_mode = #tpu.pipeline_mode<synchronous>, transform_indices = @transform_3, window_bounds = array<i64: 32, 32>}, {pipeline_mode = #tpu.pipeline_mode<synchronous>, transform_indices = @transform_4, window_bounds = array<i64: 1, 32>}, {pipeline_mode = #tpu.pipeline_mode<synchronous>, transform_indices = @transform_5, window_bounds = array<i64: 32, 32>}, {pipeline_mode = #tpu.pipeline_mode<synchronous>, transform_indices = @transform_6, window_bounds = array<i64: 1, 32>}, {pipeline_mode = #tpu.pipeline_mode<synchronous>, transform_indices = @transform_7, window_bounds = array<i64: 1, 32>}, {pipeline_mode = #tpu.pipeline_mode<synchronous>, transform_indices = @transform_8, window_bounds = array<i64: 1, 32>}, {pipeline_mode = #tpu.pipeline_mode<synchronous>, transform_indices = @transform_9, window_bounds = array<i64: 32, 384>}, {pipeline_mode = #tpu.pipeline_mode<synchronous>, transform_indices = @transform_10, window_bounds = array<i64: 1, 384>}, {pipeline_mode = #tpu.pipeline_mode<synchronous>, transform_indices = @transform_11, window_bounds = array<i64: 128, 32>}, {pipeline_mode = #tpu.pipeline_mode<synchronous>, transform_indices = @transform_12, window_bounds = array<i64: 1, 32>}, {pipeline_mode = #tpu.pipeline_mode<synchronous>, transform_indices = @transform_13, window_bounds = array<i64: 128, 32>}, {pipeline_mode = #tpu.pipeline_mode<synchronous>, transform_indices = @transform_14, window_bounds = array<i64: 1, 32>}, {transform_indices = @transform_15, window_bounds = array<i64: 8, 32>}]} {
    %c0 = arith.constant 0 : index
    %c0_0 = arith.constant 0 : index
    %0 = vector.load %arg1[%c0, %c0_0] : memref<8x32xf32, #tpu.memory_space<vmem>>, vector<8x32xf32>
    %c0_1 = arith.constant 0 : index
    %c0_2 = arith.constant 0 : index
    %1 = vector.load %arg2[%c0_1, %c0_2] : memref<1x32xf32, #tpu.memory_space<vmem>>, vector<1x32xf32>
    %c0_3 = arith.constant 0 : index
    %c0_4 = arith.constant 0 : index
    %2 = vector.load %arg3[%c0_3, %c0_4] : memref<1x32xf32, #tpu.memory_space<vmem>>, vector<1x32xf32>
    %cst = arith.constant dense<0.000000e+00> : vector<8xf32>
    %3 = vector.multi_reduction <add>, %0, %cst [1] : vector<8x32xf32> to vector<8xf32>
    %4 = vector.shape_cast %3 : vector<8xf32> to vector<8x1xf32>
    %cst_5 = arith.constant 3.200000e+01 : f32
    %5 = vector.broadcast %cst_5 : f32 to vector<8x1xf32>
    %6 = arith.divf %4, %5 : vector<8x1xf32>
    %7 = vector.broadcast %6 : vector<8x1xf32> to vector<8x32xf32>
    %8 = arith.subf %0, %7 : vector<8x32xf32>
    %9 = arith.mulf %8, %8 : vector<8x32xf32>
    %cst_6 = arith.constant dense<0.000000e+00> : vector<8xf32>
    %10 = vector.multi_reduction <add>, %9, %cst_6 [1] : vector<8x32xf32> to vector<8xf32>
    %11 = vector.shape_cast %10 : vector<8xf32> to vector<8x1xf32>
    %cst_7 = arith.constant 3.200000e+01 : f32
    %12 = vector.broadcast %cst_7 : f32 to vector<8x1xf32>
    %13 = arith.divf %11, %12 : vector<8x1xf32>
    %cst_8 = arith.constant 9.99999974E-6 : f32
    %14 = vector.broadcast %cst_8 : f32 to vector<8x1xf32>
    %15 = arith.addf %13, %14 : vector<8x1xf32>
    %16 = math.rsqrt %15 : vector<8x1xf32>
    %17 = vector.broadcast %16 : vector<8x1xf32> to vector<8x32xf32>
    %18 = arith.mulf %8, %17 : vector<8x32xf32>
    %19 = vector.broadcast %1 : vector<1x32xf32> to vector<8x32xf32>
    %20 = arith.mulf %18, %19 : vector<8x32xf32>
    %21 = vector.broadcast %2 : vector<1x32xf32> to vector<8x32xf32>
    %22 = arith.addf %20, %21 : vector<8x32xf32>
    %23 = arith.truncf %22 : vector<8x32xf32> to vector<8x32xbf16>
    %c0_9 = arith.constant 0 : index
    %c0_10 = arith.constant 0 : index
    %24 = vector.load %arg4[%c0_9, %c0_10] : memref<32x32xbf16, #tpu.memory_space<vmem>>, vector<32x32xbf16>
    %cst_11 = arith.constant dense<0.000000e+00> : vector<8x32xf32>
    %25 = tpu.matmul %23, %24, %cst_11 {dimension_numbers = #tpu.dot_dimension_numbers<[1], [0], [0], [1], [0, 0, 1, 1], [], []>} : vector<8x32xbf16>, vector<32x32xbf16>, vector<8x32xf32> -> vector<8x32xf32>
    %c0_12 = arith.constant 0 : index
    %c0_13 = arith.constant 0 : index
    %26 = vector.load %arg5[%c0_12, %c0_13] : memref<1x32xf32, #tpu.memory_space<vmem>>, vector<1x32xf32>
    %27 = vector.broadcast %26 : vector<1x32xf32> to vector<8x32xf32>
    %28 = arith.addf %25, %27 : vector<8x32xf32>
    %cst_14 = arith.constant 5.000000e-01 : f32
    %29 = vector.broadcast %cst_14 : f32 to vector<8x32xf32>
    %30 = arith.mulf %29, %28 : vector<8x32xf32>
    %cst_15 = arith.constant 0.707106769 : f32
    %31 = vector.broadcast %cst_15 : f32 to vector<8x32xf32>
    %32 = arith.mulf %28, %31 : vector<8x32xf32>
    %33 = math.erf %32 : vector<8x32xf32>
    %cst_16 = arith.constant 1.000000e+00 : f32
    %34 = vector.broadcast %cst_16 : f32 to vector<8x32xf32>
    %35 = arith.addf %34, %33 : vector<8x32xf32>
    %36 = arith.mulf %30, %35 : vector<8x32xf32>
    %37 = arith.truncf %36 : vector<8x32xf32> to vector<8x32xbf16>
    %c0_17 = arith.constant 0 : index
    %c0_18 = arith.constant 0 : index
    %38 = vector.load %arg6[%c0_17, %c0_18] : memref<32x32xbf16, #tpu.memory_space<vmem>>, vector<32x32xbf16>
    %cst_19 = arith.constant dense<0.000000e+00> : vector<8x32xf32>
    %39 = tpu.matmul %37, %38, %cst_19 {dimension_numbers = #tpu.dot_dimension_numbers<[1], [0], [0], [1], [0, 0, 1, 1], [], []>} : vector<8x32xbf16>, vector<32x32xbf16>, vector<8x32xf32> -> vector<8x32xf32>
    %c0_20 = arith.constant 0 : index
    %c0_21 = arith.constant 0 : index
    %40 = vector.load %arg7[%c0_20, %c0_21] : memref<1x32xf32, #tpu.memory_space<vmem>>, vector<1x32xf32>
    %41 = vector.broadcast %40 : vector<1x32xf32> to vector<8x32xf32>
    %42 = arith.addf %39, %41 : vector<8x32xf32>
    %43 = arith.addf %42, %0 : vector<8x32xf32>
    %c0_22 = arith.constant 0 : index
    %c0_23 = arith.constant 0 : index
    %44 = vector.load %arg8[%c0_22, %c0_23] : memref<1x32xf32, #tpu.memory_space<vmem>>, vector<1x32xf32>
    %c0_24 = arith.constant 0 : index
    %c0_25 = arith.constant 0 : index
    %45 = vector.load %arg9[%c0_24, %c0_25] : memref<1x32xf32, #tpu.memory_space<vmem>>, vector<1x32xf32>
    %cst_26 = arith.constant dense<0.000000e+00> : vector<8xf32>
    %46 = vector.multi_reduction <add>, %0, %cst_26 [1] : vector<8x32xf32> to vector<8xf32>
    %47 = vector.shape_cast %46 : vector<8xf32> to vector<8x1xf32>
    %cst_27 = arith.constant 3.200000e+01 : f32
    %48 = vector.broadcast %cst_27 : f32 to vector<8x1xf32>
    %49 = arith.divf %47, %48 : vector<8x1xf32>
    %50 = vector.broadcast %49 : vector<8x1xf32> to vector<8x32xf32>
    %51 = arith.subf %0, %50 : vector<8x32xf32>
    %52 = arith.mulf %51, %51 : vector<8x32xf32>
    %cst_28 = arith.constant dense<0.000000e+00> : vector<8xf32>
    %53 = vector.multi_reduction <add>, %52, %cst_28 [1] : vector<8x32xf32> to vector<8xf32>
    %54 = vector.shape_cast %53 : vector<8xf32> to vector<8x1xf32>
    %cst_29 = arith.constant 3.200000e+01 : f32
    %55 = vector.broadcast %cst_29 : f32 to vector<8x1xf32>
    %56 = arith.divf %54, %55 : vector<8x1xf32>
    %cst_30 = arith.constant 9.99999974E-6 : f32
    %57 = vector.broadcast %cst_30 : f32 to vector<8x1xf32>
    %58 = arith.addf %56, %57 : vector<8x1xf32>
    %59 = math.rsqrt %58 : vector<8x1xf32>
    %60 = vector.broadcast %59 : vector<8x1xf32> to vector<8x32xf32>
    %61 = arith.mulf %51, %60 : vector<8x32xf32>
    %62 = vector.broadcast %44 : vector<1x32xf32> to vector<8x32xf32>
    %63 = arith.mulf %61, %62 : vector<8x32xf32>
    %64 = vector.broadcast %45 : vector<1x32xf32> to vector<8x32xf32>
    %65 = arith.addf %63, %64 : vector<8x32xf32>
    %66 = arith.truncf %65 : vector<8x32xf32> to vector<8x32xbf16>
    %c0_31 = arith.constant 0 : index
    %c0_32 = arith.constant 0 : index
    %67 = vector.load %arg10[%c0_31, %c0_32] : memref<32x384xbf16, #tpu.memory_space<vmem>>, vector<32x384xbf16>
    %cst_33 = arith.constant dense<0.000000e+00> : vector<8x384xf32>
    %68 = tpu.matmul %66, %67, %cst_33 {dimension_numbers = #tpu.dot_dimension_numbers<[1], [0], [0], [1], [0, 0, 1, 1], [], []>} : vector<8x32xbf16>, vector<32x384xbf16>, vector<8x384xf32> -> vector<8x384xf32>
    %c0_34 = arith.constant 0 : index
    %c0_35 = arith.constant 0 : index
    %69 = vector.load %arg11[%c0_34, %c0_35] : memref<1x384xf32, #tpu.memory_space<vmem>>, vector<1x384xf32>
    %70 = vector.broadcast %69 : vector<1x384xf32> to vector<8x384xf32>
    %71 = arith.addf %68, %70 : vector<8x384xf32>
    %72 = vector.extract_strided_slice %71 {offsets = [0, 0], sizes = [8, 128], strides = [1, 1]} : vector<8x384xf32> to vector<8x128xf32>
    %73 = arith.negf %72 : vector<8x128xf32>
    %74 = math.exp %73 : vector<8x128xf32>
    %cst_36 = arith.constant 1.000000e+00 : f32
    %75 = vector.broadcast %cst_36 : f32 to vector<8x128xf32>
    %76 = arith.addf %75, %74 : vector<8x128xf32>
    %77 = arith.divf %75, %76 : vector<8x128xf32>
    %78 = vector.extract_strided_slice %71 {offsets = [0, 128], sizes = [8, 128], strides = [1, 1]} : vector<8x384xf32> to vector<8x128xf32>
    %79 = math.tanh %78 : vector<8x128xf32>
    %80 = vector.extract_strided_slice %71 {offsets = [0, 256], sizes = [8, 128], strides = [1, 1]} : vector<8x384xf32> to vector<8x128xf32>
    %81 = arith.negf %80 : vector<8x128xf32>
    %82 = math.exp %81 : vector<8x128xf32>
    %cst_37 = arith.constant 1.000000e+00 : f32
    %83 = vector.broadcast %cst_37 : f32 to vector<8x128xf32>
    %84 = arith.addf %83, %82 : vector<8x128xf32>
    %85 = arith.divf %83, %84 : vector<8x128xf32>
    %86 = arith.mulf %77, %79 : vector<8x128xf32>
    %87 = math.tanh %86 : vector<8x128xf32>
    %88 = arith.mulf %85, %87 : vector<8x128xf32>
    %cst_38 = arith.constant 5.000000e-01 : f32
    %89 = vector.broadcast %cst_38 : f32 to vector<8x128xf32>
    %90 = arith.mulf %89, %88 : vector<8x128xf32>
    %cst_39 = arith.constant 0.707106769 : f32
    %91 = vector.broadcast %cst_39 : f32 to vector<8x128xf32>
    %92 = arith.mulf %88, %91 : vector<8x128xf32>
    %93 = math.erf %92 : vector<8x128xf32>
    %cst_40 = arith.constant 1.000000e+00 : f32
    %94 = vector.broadcast %cst_40 : f32 to vector<8x128xf32>
    %95 = arith.addf %94, %93 : vector<8x128xf32>
    %96 = arith.mulf %90, %95 : vector<8x128xf32>
    %97 = arith.truncf %96 : vector<8x128xf32> to vector<8x128xbf16>
    %c0_41 = arith.constant 0 : index
    %c0_42 = arith.constant 0 : index
    %98 = vector.load %arg12[%c0_41, %c0_42] : memref<128x32xbf16, #tpu.memory_space<vmem>>, vector<128x32xbf16>
    %cst_43 = arith.constant dense<0.000000e+00> : vector<8x32xf32>
    %99 = tpu.matmul %97, %98, %cst_43 {dimension_numbers = #tpu.dot_dimension_numbers<[1], [0], [0], [1], [0, 0, 1, 1], [], []>} : vector<8x128xbf16>, vector<128x32xbf16>, vector<8x32xf32> -> vector<8x32xf32>
    %c0_44 = arith.constant 0 : index
    %c0_45 = arith.constant 0 : index
    %100 = vector.load %arg13[%c0_44, %c0_45] : memref<1x32xf32, #tpu.memory_space<vmem>>, vector<1x32xf32>
    %101 = vector.broadcast %100 : vector<1x32xf32> to vector<8x32xf32>
    %102 = arith.addf %99, %101 : vector<8x32xf32>
    %c0_46 = arith.constant 0 : index
    %c0_47 = arith.constant 0 : index
    %103 = vector.load %arg14[%c0_46, %c0_47] : memref<128x32xbf16, #tpu.memory_space<vmem>>, vector<128x32xbf16>
    %cst_48 = arith.constant dense<0.000000e+00> : vector<8x32xf32>
    %104 = tpu.matmul %97, %103, %cst_48 {dimension_numbers = #tpu.dot_dimension_numbers<[1], [0], [0], [1], [0, 0, 1, 1], [], []>} : vector<8x128xbf16>, vector<128x32xbf16>, vector<8x32xf32> -> vector<8x32xf32>
    %c0_49 = arith.constant 0 : index
    %c0_50 = arith.constant 0 : index
    %105 = vector.load %arg15[%c0_49, %c0_50] : memref<1x32xf32, #tpu.memory_space<vmem>>, vector<1x32xf32>
    %106 = vector.broadcast %105 : vector<1x32xf32> to vector<8x32xf32>
    %107 = arith.addf %104, %106 : vector<8x32xf32>
    %108 = arith.negf %107 : vector<8x32xf32>
    %109 = math.exp %108 : vector<8x32xf32>
    %cst_51 = arith.constant 1.000000e+00 : f32
    %110 = vector.broadcast %cst_51 : f32 to vector<8x32xf32>
    %111 = arith.addf %110, %109 : vector<8x32xf32>
    %112 = arith.divf %110, %111 : vector<8x32xf32>
    %113 = arith.mulf %102, %112 : vector<8x32xf32>
    %114 = arith.addf %113, %43 : vector<8x32xf32>
    %c0_52 = arith.constant 0 : index
    %c0_53 = arith.constant 0 : index
    %115 = vector.load %arg16[%c0_52, %c0_53] : memref<8x32xf32, #tpu.memory_space<vmem>>, vector<8x32xf32>
    tpu.vector_store %arg16[%c0_52, %c0_53], %114 {strides = array<i32>} : memref<8x32xf32, #tpu.memory_space<vmem>>, vector<8x32xf32>,
    return
  }
  func.func @transform_0(%arg0: i32) -> (i32, i32) {
    %c0_i32 = arith.constant 0 : i32
    %c0_i32_0 = arith.constant 0 : i32
    return %arg0, %c0_i32 : i32, i32
  }
  func.func @transform_1(%arg0: i32) -> (i32, i32) {
    %c0_i32 = arith.constant 0 : i32
    %c0_i32_0 = arith.constant 0 : i32
    %c0_i32_1 = arith.constant 0 : i32
    return %c0_i32, %c0_i32_0 : i32, i32
  }
  func.func @transform_2(%arg0: i32) -> (i32, i32) {
    %c0_i32 = arith.constant 0 : i32
    %c0_i32_0 = arith.constant 0 : i32
    %c0_i32_1 = arith.constant 0 : i32
    return %c0_i32, %c0_i32_0 : i32, i32
  }
  func.func @transform_3(%arg0: i32) -> (i32, i32) {
    %c0_i32 = arith.constant 0 : i32
    %c0_i32_0 = arith.constant 0 : i32
    %c0_i32_1 = arith.constant 0 : i32
    return %c0_i32, %c0_i32_0 : i32, i32
  }
  func.func @transform_4(%arg0: i32) -> (i32, i32) {
    %c0_i32 = arith.constant 0 : i32
    %c0_i32_0 = arith.constant 0 : i32
    %c0_i32_1 = arith.constant 0 : i32
    return %c0_i32, %c0_i32_0 : i32, i32
  }
  func.func @transform_5(%arg0: i32) -> (i32, i32) {
    %c0_i32 = arith.constant 0 : i32
    %c0_i32_0 = arith.constant 0 : i32
    %c0_i32_1 = arith.constant 0 : i32
    return %c0_i32, %c0_i32_0 : i32, i32
  }
  func.func @transform_6(%arg0: i32) -> (i32, i32) {
    %c0_i32 = arith.constant 0 : i32
    %c0_i32_0 = arith.constant 0 : i32
    %c0_i32_1 = arith.constant 0 : i32
    return %c0_i32, %c0_i32_0 : i32, i32
  }
  func.func @transform_7(%arg0: i32) -> (i32, i32) {
    %c0_i32 = arith.constant 0 : i32
    %c0_i32_0 = arith.constant 0 : i32
    %c0_i32_1 = arith.constant 0 : i32
    return %c0_i32, %c0_i32_0 : i32, i32
  }
  func.func @transform_8(%arg0: i32) -> (i32, i32) {
    %c0_i32 = arith.constant 0 : i32
    %c0_i32_0 = arith.constant 0 : i32
    %c0_i32_1 = arith.constant 0 : i32
    return %c0_i32, %c0_i32_0 : i32, i32
  }
  func.func @transform_9(%arg0: i32) -> (i32, i32) {
    %c0_i32 = arith.constant 0 : i32
    %c0_i32_0 = arith.constant 0 : i32
    %c0_i32_1 = arith.constant 0 : i32
    return %c0_i32, %c0_i32_0 : i32, i32
  }
  func.func @transform_10(%arg0: i32) -> (i32, i32) {
    %c0_i32 = arith.constant 0 : i32
    %c0_i32_0 = arith.constant 0 : i32
    %c0_i32_1 = arith.constant 0 : i32
    return %c0_i32, %c0_i32_0 : i32, i32
  }
  func.func @transform_11(%arg0: i32) -> (i32, i32) {
    %c0_i32 = arith.constant 0 : i32
    %c0_i32_0 = arith.constant 0 : i32
    %c0_i32_1 = arith.constant 0 : i32
    return %c0_i32, %c0_i32_0 : i32, i32
  }
  func.func @transform_12(%arg0: i32) -> (i32, i32) {
    %c0_i32 = arith.constant 0 : i32
    %c0_i32_0 = arith.constant 0 : i32
    %c0_i32_1 = arith.constant 0 : i32
    return %c0_i32, %c0_i32_0 : i32, i32
  }
  func.func @transform_13(%arg0: i32) -> (i32, i32) {
    %c0_i32 = arith.constant 0 : i32
    %c0_i32_0 = arith.constant 0 : i32
    %c0_i32_1 = arith.constant 0 : i32
    return %c0_i32, %c0_i32_0 : i32, i32
  }
  func.func @transform_14(%arg0: i32) -> (i32, i32) {
    %c0_i32 = arith.constant 0 : i32
    %c0_i32_0 = arith.constant 0 : i32
    %c0_i32_1 = arith.constant 0 : i32
    return %c0_i32, %c0_i32_0 : i32, i32
  }
  func.func @transform_15(%arg0: i32) -> (i32, i32) {
    %c0_i32 = arith.constant 0 : i32
    %c0_i32_0 = arith.constant 0 : i32
    return %arg0, %c0_i32 : i32, i32
  }
}

</mosaic_0001>

<bundles_post_ra>
// kernel: lstm_layer_forward.2
= control target key start
LH: loop header
LB: loop body
LE: loop exit
PB: predicated region body
PF: predicated region fallthrough
CT: control target
= control target key end

     0   :  { %7 = vsyncpa [#allocation3], 0  ;;  %s774_s0 = inlined_call_operand.hbm [shape: f32[2,4,8,8], index: 0, kind: input, shape index: {}]   ;;  %s775_s1 = inlined_call_operand.hbm [shape: f32[2,8,32], index: 1, kind: input, shape index: {}]   ;;  %s776_s2 = inlined_call_operand.vmem [shape: f32[2,8,32], index: 2, kind: output, shape index: {}]  }
   0x1   :  { %9 = vsyncpa [#allocation3 + $0x1], 0 }
   0x2   :  { %10 = vsyncpa [#allocation5], 0 }
   0x3   :  { %12 = vsyncpa [#allocation5 + $0x1], 0  ;;  %s605_s9 = smov 0   ;;  %s607_s10 = smov 0  }
   0x4   :  { %s609_s11 = smov 0   ;;  %s611_s12 = smov 0  }
   0x5   :  { %s613_s13 = smov 0   ;;  %s615_s14 = smov 0  }
   0x6 LB: > { %s383_s15 = sadd.s32 4294967295, %s584_s14   ;;  %s30_s16 = sadd.s32 1, %s580_s13  ;;  %s584_s14 = sphi %s615_s14, %s18_s14   ;;  %s580_s13 = sphi %s613_s13, %s790_s13   ;;  %s576_s12 = sphi %s611_s12, %s789_s12   ;;  %s572_s11 = sphi %s609_s11, %s788_s11   ;;  %s568_s10 = sphi %s607_s10, %s787_s10   ;;  %s564_s9 = sphi %s605_s9, %s786_s9  }
   0x7   : > { %p32_p0 = scmp.ge.s32.totalorder %s30_s16, 2  ;;  %s39_s17 = sadd.s32 1, %s572_s11 }
   0x8   : > { %p46_p1 = scmp.ne.s32.totalorder %s572_s11, %s568_s10  ;;  %p47_p2 = scmp.eq.s32.totalorder %s584_s14, 0 }
   0x9   : > { %s792_s16 = smov (%p32_p0, %s30_s16), 0  ;;  %p52_p4 = scmp.ne.s32.totalorder %s568_s10, %s564_s9 }
   0xa   : > { %p641_p3 = por %p47_p2, %p46_p1  ;;  %s34_s19 = ssub.s32 %s580_s13, %s792_s16 }
   0xb   : > { %p53_p5 = scmp.eq.s32.totalorder %s383_s15, 0  ;;  %p37_p6 = scmp.eq.s32.totalorder %s34_s19, 0 }
   0xc   : > { %p419_p8 = scmp.lt.s32.totalorder %s584_s14, 2  ;;  %s657_s22 = sand.u32 1, %s572_s11  }
   0xd   : > { %p648_p7 = por %p53_p5, %p52_p4  ;;  %s399_s23 = sshll.u32 %s580_s13, 9 }
   0xe   : > { %s654_s21 = scalar_select %p37_p6, %s572_s11, %s39_s17  }
   0xf   : > { %s779_s20 = scalar_select %p648_p7, 1, 0 }
  0x10   : > { %s387_s24 = sshll.u32 %s657_s22, 3  ;;  %s664_s27 = scalar_lea.hbm %s774_s0, %s399_s23 }
  0x11   : > { %s134_s28 = scalar_lea.vmem [#allocation2], %s387_s24  ;;  %p670_p9 = pnand %p419_p8, %p641_p3 }
  0x12   : > { %s143_s29 = sshll.u32 %s134_s28, 4  ;;  %s131_s3 = scalar_lea.sflag [#allocation3], %s657_s22  ;;  %s674_s29 = int_to_ptr.vmem [resolvable:$true] %s143_s29 }
  0x13   : > { %s470_s4 = scalar_lea.hbm %s664_s27, 128  ;;  %p472_p13 = pneg %p670_p9 }
  0x14   : > { %p471_p12 = scmp.ne.s32.totalorder %s664_s27, %s470_s4  ;;  %s475_s7 = scalar_lea.hbm %s774_s0, 1024 }
  0x15   : > { %p476_p2 = scmp.lt.u32.totalorder %s664_s27, %s774_s0  ;;  %p477_p3 = scmp.lt.u32.totalorder %s475_s7, %s470_s4 }
  0x16   : > { %p473_p0 = pnand %p472_p13, %p471_p12  ;;  %p479_p5 = scmp.lt.u32.totalorder %s470_s4, %s664_s27 }
  0x17   : > { %p478_p4 = por %p477_p3, %p476_p2 }
  0x18   : > { %p474_p1 = pneg %p473_p0 }
  0x19   : > { %p480_p6 = por %p479_p5, %p478_p4 }
  0x1b   : > { %p481_p8 = pnand %p480_p6, %p474_p1 }
  0x1d   : > { %484 = shalt.err (!%p481_p8)
}
  0x1e   : > { %s485_s15 = scalar_lea.vmem %s674_s29, 128  ;;  %s586_s17 = smov [#allocation2]  }
  0x1f   : > { %p486_p12 = scmp.ne.s32.totalorder %s674_s29, %s485_s15  ;;  %s490_s18 = sshll.u32 %s586_s17, 4  ;;  %s491_s18 = int_to_ptr.vmem [resolvable:$false] %s490_s18 }
  0x20   : > { %s492_s19 = scalar_lea.vmem %s491_s18, 256  ;;  %p493_p11 = scmp.lt.s32.totalorder %s674_s29, %s491_s18 }
  0x21   : > { %p488_p0 = pnand %p486_p12, %p472_p13  ;;  %p494_p2 = scmp.lt.s32.totalorder %s492_s19, %s485_s15 }
  0x23   : > { %p489_p10 = pneg %p488_p0  ;;  %p495_p3 = por %p494_p2, %p493_p11 }
  0x25   : > { %p496_p4 = pnand %p495_p3, %p489_p10 }
  0x27   : > { %499 = shalt.err (!%p496_p4)
}
  0x28   : > { %415 = dma.hbm_to_vmem [thread:$0]  (!%p670_p9), %s664_s27, 128, %s674_s29, %s131_s3  }
  0x29   : > { %p781_p1 = scmp.lt.s32.totalorder %s584_s14, 3  ;;  %p782_p5 = scmp.ge.s32.totalorder %s584_s14, 1 }
  0x2a   : > { %s391_s25 = sshll.u32 %s580_s13, 7  ;;  %s154_s5 = scalar_lea.vmem [#allocation4], %s387_s24 }
  0x2b   : > { %p708_p6 = pnand %p782_p5, %p781_p1  ;;  %s716_s4 = scalar_lea.hbm %s775_s1, %s391_s25 }
  0x2c   : > { %s161_s6 = sshll.u32 %s154_s5, 4  ;;  %s151_s27 = scalar_lea.sflag [#allocation5], %s657_s22  ;;  %s162_s6 = int_to_ptr.vmem [resolvable:$true] %s161_s6 }
  0x2d   : > { %s783_s23 = scalar_select %p708_p6, 1, 0 }
  0x2e   : > { %s500_s29 = scalar_lea.hbm %s716_s4, 128  ;;  %s505_s8 = scalar_lea.hbm %s775_s1, 256 }
  0x2f   : > { %p501_p10 = scmp.ne.s32.totalorder %s716_s4, %s500_s29  ;;  %p506_p12 = scmp.lt.u32.totalorder %s716_s4, %s775_s1 }
  0x30   : > { %p507_p0 = scmp.lt.u32.totalorder %s505_s8, %s500_s29  ;;  %p509_p3 = scmp.lt.u32.totalorder %s500_s29, %s716_s4 }
  0x31   : > { %p503_p11 = pnand %p501_p10, %p472_p13 }
  0x32   : > { %p508_p2 = por %p507_p0, %p506_p12 }
  0x33   : > { %p504_p8 = pneg %p503_p11 }
  0x34   : > { %p510_p4 = por %p509_p3, %p508_p2 }
  0x36   : > { %p511_p1 = pnand %p510_p4, %p504_p8 }
  0x38   : > { %514 = shalt.err (!%p511_p1)
}
  0x39   : > { %s515_s22 = scalar_lea.vmem %s162_s6, 128  ;;  %s587_s24 = smov [#allocation4]  }
  0x3a   : > { %p516_p5 = scmp.ne.s32.totalorder %s162_s6, %s515_s22  ;;  %s520_s17 = sshll.u32 %s587_s24, 4  ;;  %s521_s17 = int_to_ptr.vmem [resolvable:$false] %s520_s17 }
  0x3b   : > { %s522_s18 = scalar_lea.vmem %s521_s17, 256  ;;  %p523_p7 = scmp.lt.s32.totalorder %s162_s6, %s521_s17 }
  0x3c   : > { %p518_p10 = pnand %p516_p5, %p472_p13  ;;  %p524_p6 = scmp.lt.s32.totalorder %s522_s18, %s515_s22 }
  0x3e   : > { %p519_p11 = pneg %p518_p10  ;;  %p525_p0 = por %p524_p6, %p523_p7 }
  0x40   : > { %p526_p12 = pnand %p525_p0, %p519_p11 }
  0x42   : > { %529 = shalt.err (!%p526_p12)
}
  0x43   : > { %418 = dma.hbm_to_vmem [thread:$0]  (!%p670_p9), %s716_s4, 128, %s162_s6, %s151_s27  }
  0x44   : > { %p784_p8 = scmp.ne.s32.totalorder %s783_s23, 0 }
  0x45   : > { %s172_s19 = sand.u32 (!%p784_p8), 1, %s568_s10   ;;  %p785_p13 = scmp.ne.s32.totalorder (!%p784_p8), %s779_s20, 0 }
  0x46   : > { %170 = sbr.rel (%p784_p8) target bundleno = 302 (0x12e), region = 28  ;;  %s393_s25 = sshll.u32 (!%p784_p8), %s172_s19, 3 }
  0x47   : > { %s173_s26 = scalar_lea.sflag (!%p784_p8), [#allocation3], %s172_s19  ;;  %s176_s28 = scalar_lea.vmem (!%p784_p8), [#allocation2], %s393_s25 }
  0x4d   : > { %555 = dma.done.wait (%p785_p13), %s173_s26, 128  }
  0x4e   : > { %557 = vsyncadd (%p785_p13), %s173_s26, 4294967168  ;;  %s182_s5 = scalar_lea.sflag [#allocation5], %s172_s19  ;;  %s185_s29 = scalar_lea.vmem [#allocation4], %s393_s25 }
  0x4f   : > { %559 = dma.done.wait (%p785_p13), %s182_s5, 128  }
  0x50   : > { %561 = vsyncadd (%p785_p13), %s182_s5, 4294967168  ;;  %v588_v0 = vmov 0.0   ;;  %vm589_vm0 = vmmov 0   ;;  %v223_v1 = vld [vmem:[%s185_s29] sm:$0xff]  ;;  %vm229_vm1 = vcmask 1043456   ;;  %v221_v2 = vld [vmem:[%s176_s28] sm:$0xff] }
  0x51   : > { %402 = vmatprep.subr.bf16.mxu0 %v588_v0  ;;  %404 = vmatprep.mubr.msk.bf16.mxu0 %vm589_vm0, %v588_v0  ;;  %v224_v3 = vpack.c.bf16 %v223_v1, %v223_v1  ;;  %v222_v5 = vpack.c.bf16 %v221_v2, %v221_v2  ;;  %vm225_vm2 = vcmask 64512   ;;  %p213_p7 = scmp.lt.s32.totalorder %s576_s12, 1  ;;  %vm273_vm3 = vcmask 261120  }
  0x53   : > { %v231_v4 = vsel %vm229_vm1, %v224_v3, 0  ;;  %s794_s12 = smov (!%p213_p7, %s576_s12), 1 }
  0x54   : > { %403 = vmatpush3.bf16.msra.mxu0 %v231_v4  ;;  %s395_s30 = sshll.u32 %s794_s12, 3 }
  0x55   : > { %s219_s4 = scalar_lea.vmem %s776_s2, %s395_s30 }
  0x57   : > { %405 = vmatmul.mubr.msk.bf16.vlgmr.msra.gmra.mrb[0].mxu0 %vm225_vm2, %v222_v5 }
 0x12a   : > { %v267_v6 = vpop.f32.mrb[0].mxu0 }
 0x12b   : > { %274 = vst.msk [vmem:[%s219_s4] sm:$0xff] %vm273_vm3, %v267_v6  ;;  %v406_v7 = vpop.f32.mrb[1].mxu0 }
 0x12c   : > { %v270_v8 = vpop.f32.mrb[2].mxu0 }
 0x12d   : > { %v407_v9 = vpop.f32.mrb[3].mxu0 }
 0x12e PF: > { %s18_s14 = sadd.s32 1, %s584_s14   ;;  %s786_s9 = smov %s568_s10 }
 0x12f   : > { %p15_p9 = scmp.ge.s32.totalorder %s18_s14, 4   ;;  %s787_s10 = smov %s572_s11 }
 0x130   : > { %s788_s11 = smov %s654_s21  ;;  %s789_s12 = smov %s580_s13 }
 0x131   : > { %s790_s13 = smov %s792_s16  ;;  %17 = sbr.rel (!%p15_p9) target bundleno = 6 (0x6), region = 81 }
 0x138   :  { %300 = vsyncpa [#allocation3], 1 }
 0x139   :  { %302 = vsyncpa [#allocation3 + $0x1], 1 }
 0x13a   :  { %303 = vsyncpa [#allocation5], 1 }
 0x13b   :  { %305 = vsyncpa [#allocation5 + $0x1], 1 }

// kernel: lstm_layer_forward.3
= control target key start
LH: loop header
LB: loop body
LE: loop exit
PB: predicated region body
PF: predicated region fallthrough
CT: control target
= control target key end

     0   :  { %s1788_s0 = inlined_call_operand.vmem [shape: f32[16,32], index: 0, kind: input, shape index: {}]   ;;  %s1789_s1 = inlined_call_operand.vmem [shape: f32[1,32], index: 1, kind: input, shape index: {}]   ;;  %s1790_s2 = inlined_call_operand.vmem [shape: f32[1,32], index: 2, kind: input, shape index: {}]   ;;  %s1791_s3 = inlined_call_operand.vmem [shape: bf16[32,32], index: 3, kind: input, shape index: {}]   ;;  %s1792_s4 = inlined_call_operand.vmem [shape: f32[1,32], index: 4, kind: input, shape index: {}]   ;;  %s1793_s5 = inlined_call_operand.vmem [shape: bf16[32,32], index: 5, kind: input, shape index: {}]   ;;  %s1794_s6 = inlined_call_operand.vmem [shape: f32[1,32], index: 6, kind: input, shape index: {}]   ;;  %s1795_s7 = inlined_call_operand.vmem [shape: f32[1,32], index: 7, kind: input, shape index: {}]   ;;  %s1796_s8 = inlined_call_operand.vmem [shape: f32[1,32], index: 8, kind: input, shape index: {}]   ;;  %s1797_s9 = inlined_call_operand.vmem [shape: bf16[32,384], index: 9, kind: input, shape index: {}]   ;;  %s1798_s10 = inlined_call_operand.vmem [shape: f32[1,384], index: 10, kind: input, shape index: {}]   ;;  %s1799_s11 = inlined_call_operand.vmem [shape: bf16[128,32], index: 11, kind: input, shape index: {}]   ;;  %s1800_s12 = inlined_call_operand.vmem [shape: f32[1,32], index: 12, kind: input, shape index: {}]   ;;  %s1801_s13 = inlined_call_operand.vmem [shape: bf16[128,32], index: 13, kind: input, shape index: {}]   ;;  %s1802_s14 = inlined_call_operand.vmem [shape: f32[1,32], index: 14, kind: input, shape index: {}]   ;;  %s1803_s15 = inlined_call_operand.hbm [shape: f32[16,32], index: 15, kind: output, shape index: {}]  }
   0x1   :  { %1804 = sst [smem:[#allocation6_spill]] %s1788_s0 }
   0x2   :  { %1805 = sst [smem:[#allocation7_spill]] %s1789_s1 }
   0x3   :  { %1806 = sst [smem:[#allocation8_spill]] %s1790_s2 }
   0x4   :  { %1807 = sst [smem:[#allocation9_spill]] %s1791_s3 }
   0x5   :  { %20 = vsyncpa [#allocation3], 0 }
   0x6   :  { %22 = vsyncpa [#allocation3 + $0x1], 0  ;;  %s1529_s18 = smov 0   ;;  %s1531_s19 = smov 0  }
   0x7   :  { %s1533_s20 = smov 0   ;;  %s1535_s21 = smov 0  }
   0x8 LB: > { %s1550_s22 = sadd.s32 4294967295, %s1443_s21   ;;  %s1147_s23 = sadd.s32 4294967294, %s1443_s21   ;;  %s1443_s21 = sphi %s1535_s21, %s1819_s21   ;;  %s1439_s20 = sphi %s1533_s20, %s1818_s20   ;;  %s1435_s19 = sphi %s1531_s19, %s1817_s19   ;;  %s1431_s18 = sphi %s1529_s18, %s1816_s18  }
   0x9   : > { %s1554_s24 = sadd.s32 1, %s1443_s21   ;;  %s355_s25 = sadd.s32 1, %s1439_s20 }
   0xa   : > { %s352_s26 = ssub.s32 %s1443_s21, %s1554_s24  ;;  %p365_p0 = scmp.ne.s32.totalorder %s1439_s20, %s1435_s19 }
   0xb   : > { %p353_p1 = scmp.eq.s32.totalorder %s352_s26, 0  ;;  %p366_p2 = scmp.eq.s32.totalorder %s1550_s22, 1 }
   0xc   : > { %p371_p3 = scmp.ne.s32.totalorder %s1435_s19, %s1431_s18  ;;  %p372_p4 = scmp.eq.s32.totalorder %s1147_s23, 1 }
   0xd   : > { %s1565_s27 = scalar_select %p353_p1, %s1439_s20, %s355_s25  }
   0xe   : > { %p1567_p5 = por %p366_p2, %p365_p0  ;;  %p1571_p6 = por %p372_p4, %p371_p3 }
   0xf   : > { %1808 = sst [smem:[#allocation5_spill]] %s1565_s27  ;;  %p1150_p7 = scmp.ge.s32.totalorder %s1443_s21, 1 }
  0x10   : > { %p439_p8 = scmp.lt.s32.totalorder %s1443_s21, 3 }
  0x12   : > { %p440_p9 = pnand %p1150_p7, %p439_p8 }
  0x13   : > { %p486_p10 = scmp.lt.s32.totalorder (!%p440_p9), %s1550_s22, 1  ;;  %vm494_vm0 = vcmask (!%p440_p9), 261120   ;;  %s1811_s0 = sld [smem:[#allocation6_spill]] (!%p440_p9)  ;;  %v1445_v8 = vmov (!%p440_p9), 0.0   ;;  %vm1446_vm1 = vmmov (!%p440_p9), 0   ;;  %v1447_v27 = vmov (!%p440_p9), 0  }
  0x14   : > { %443 = sbr.rel (%p440_p9) target bundleno = 1107 (0x453), region = 80  ;;  %s1812_s3 = sld [smem:[#allocation9_spill]] (!%p440_p9)  ;;  %1225 = vmatprep.subr.bf16.mxu0 (!%p440_p9), %v1445_v8  ;;  %1233 = vmatprep.subr.bf16.mxu1 (!%p440_p9), %v1445_v8  ;;  %v1335_v10 = vld [vmem:[%s1797_s9 + $0x4] ss:$12 sps:$4 sm:$0xff] (!%p440_p9)   ;;  %v1163_v19 = vld [vmem:[%s1795_s7] ss:$0 sm:$0xff] (!%p440_p9)  ;;  %v690_v32 = vlaneseq (!%p440_p9) }
  0x15   : > { %1229 = vmatprep.mubr.msk.bf16.mxu0 (!%p440_p9), %vm1446_vm1, %v1445_v8  ;;  %1237 = vmatprep.mubr.msk.bf16.mxu1 (!%p440_p9), %vm1446_vm1, %v1445_v8  ;;  %s1813_s1 = sld [smem:[#allocation7_spill]] (!%p440_p9)  ;;  %s1814_s2 = sld [smem:[#allocation8_spill]] (!%p440_p9)  ;;  %v1333_v21 = vld [vmem:[%s1797_s9] ss:$12 sps:$4 sm:$0xff] (!%p440_p9)   ;;  %v1338_v24 = vld [vmem:[%s1797_s9 + $0x1c] ss:$12 sps:$4 sm:$0xff] (!%p440_p9)  }
  0x16   : > { %v1164_v25 = vld [vmem:[%s1796_s8] ss:$0 sm:$0xff] (!%p440_p9)  ;;  %v1336_v26 = vld [vmem:[%s1797_s9 + $0x18] ss:$12 sps:$4 sm:$0xff] (!%p440_p9)   ;;  %v1340_v31 = vld [vmem:[%s1793_s5 + $0x8] sm:$0xff] (!%p440_p9)   ;;  %v1638_v33 = vshrl.u32 (!%p440_p9), %v690_v32, 7 }
  0x17   : > { %v1339_v30 = vld [vmem:[%s1793_s5] sm:$0xff] (!%p440_p9)   ;;  %v1341_v56 = vld [vmem:[%s1797_s9 + $0x8] ss:$12 sps:$4 sm:$0xff] (!%p440_p9)   ;;  %s483_s26 = sand.u32 (!%p440_p9), 1, %s1435_s19  }
  0x18   : > { %1234 = vmatpush3.bf16.msra.mxu1 (!%p440_p9), %v1339_v30  ;;  %v1155_v34 = vld [vmem:[%s1792_s4] ss:$0 sm:$0xff] (!%p440_p9)  ;;  %v692_v38 = vsub.s32 (!%p440_p9), 0, %v1638_v33  ;;  %v696_v50 = vsub.s32 (!%p440_p9), 1, %v1638_v33 }
  0x19   : > { %1235 = vmatprep.subr.bf16.mxu1 (!%p440_p9), %v1445_v8  ;;  %v1647_v40 = vld [vmem:[%s1798_s10] sm:$0x7] (!%p440_p9) }
  0x1a   : > { %v1331_v7 = vld [vmem:[%s1812_s3] sm:$0xff] (!%p440_p9)   ;;  %v1332_v9 = vld [vmem:[%s1812_s3 + $0x8] sm:$0xff] (!%p440_p9)   ;;  %v693_v43 = vrot.slane (!%p440_p9), %v1647_v40, %v692_v38  ;;  %v697_v54 = vrot.slane (!%p440_p9), %v1647_v40, %v696_v50  ;;  %s1151_s3 = sshll.u32 (!%p440_p9), %s483_s26, 3 }
  0x1b   : > { %s487_s30 = scalar_select %p486_p10, %s1550_s22, 1  ;;  %1226 = vmatpush3.bf16.msra.mxu0 %v1331_v7  ;;  %v1153_v15 = vld [vmem:[%s1813_s1] ss:$0 sm:$0xff]  ;;  %v1348_v7 = vld [vmem:[%s1801_s13 + $0x10] sm:$0xff]  }
  0x1c   : > { %1227 = vmatprep.subr.bf16.mxu0 %v1445_v8  ;;  %v1154_v17 = vld [vmem:[%s1814_s2] ss:$0 sm:$0xff]  ;;  %1236 = vmatpush3.bf16.msra.mxu1 %v1340_v31  ;;  %s485_s17 = scalar_lea.vmem [#allocation2], %s1151_s3  ;;  %s1448_s3 = smov [#allocation2]  }
  0x1d   : > { %s1152_s16 = sshll.u32 %s487_s30, 3  ;;  %1241 = vmatprep.subr.bf16.mxu1 %v1445_v8  ;;  %v1342_v60 = vld [vmem:[%s1797_s9 + $0x20] ss:$12 sps:$4 sm:$0xff]   ;;  %s1088_s23 = sshll.u32 %s485_s17, 4  ;;  %s1747_s23 = int_to_ptr.vmem [resolvable:$true] %s1088_s23 }
  0x1e   : > { %s489_s25 = scalar_lea.vmem %s1811_s0, %s1152_s16  ;;  %s1195_s16 = sshll.u32 %s1550_s22, 7 }
  0x1f   : > { %v1582_v0 = vld [vmem:[%s489_s25] sm:$0xff]  ;;  %1228 = vmatpush3.bf16.msra.mxu0 %v1332_v9  ;;  %v1349_v9 = vld [vmem:[%s1799_s11 + $0x18] sm:$0xff]   ;;  %s1745_s30 = scalar_lea.hbm %s1803_s15, %s1195_s16  ;;  %s1075_s0 = scalar_lea.sflag [#allocation3], %s483_s26 }
  0x20   : > { %v495_v1 = vsel %vm494_vm0, %v1582_v0, 0.0  ;;  %740 = vmatprep.subr.bf16.mxu0 %v1335_v10  ;;  %v1350_v10 = vld [vmem:[%s1801_s13 + $0x18] sm:$0xff]   ;;  %s1381_s22 = scalar_lea.vmem %s1747_s23, 128  ;;  %s1385_s1 = sshll.u32 %s1448_s3, 4  ;;  %s1386_s1 = int_to_ptr.vmem [resolvable:$false] %s1385_s1 }
  0x21   : > { %496 = vadd.xlane.f32.xlu0 %v495_v1  ;;  %p1382_p11 = scmp.ne.s32.totalorder %s1747_s23, %s1381_s22  ;;  %s1387_s27 = scalar_lea.vmem %s1386_s1, 256 }
  0x22   : > { %p1388_p0 = scmp.lt.s32.totalorder %s1747_s23, %s1386_s1  ;;  %p1389_p1 = scmp.lt.s32.totalorder %s1387_s27, %s1381_s22 }
  0x23   : > { %p1383_p12 = pnand %p1382_p11, %p1567_p5 }
  0x24   : > { %p1390_p2 = por %p1389_p1, %p1388_p0 }
  0x25   : > { %p1384_p13 = pneg %p1383_p12 }
  0x27   : > { %p1391_p3 = pnand %p1390_p2, %p1384_p13 }
  0xae   : > { %v497_v2 = vpop.xlane.xlu0 %496 }
  0xaf   : > { %v499_v3 = vmul.f32 0.03125, %v497_v2  ;;  %v1343_v2 = vld [vmem:[%s1799_s11] sm:$0xff]  }
  0xb1   : > { %v500_v4 = vsub.f32 %v1582_v0, %v499_v3  ;;  %v1344_v3 = vld [vmem:[%s1801_s13] sm:$0xff]  }
  0xb3   : > { %v501_v5 = vmul.f32 %v500_v4, %v500_v4 }
  0xb5   : > { %v502_v6 = vsel %vm494_vm0, %v501_v5, 0.0  ;;  %v1346_v5 = vld [vmem:[%s1801_s13 + $0x8] sm:$0xff]  }
  0xb6   : > { %503 = vadd.xlane.f32.xlu0 %v502_v6  ;;  %v1347_v6 = vld [vmem:[%s1799_s11 + $0x10] sm:$0xff]  }
 0x143   : > { %v504_v11 = vpop.xlane.xlu0 %503 }
 0x144   : > { %v505_v12 = vmul.f32 0.03125, %v504_v11  ;;  %v1351_v11 = vld [vmem:[%s1799_s11 + $0x20] sm:$0xff]  }
 0x146   : > { %v506_v13 = vadd.f32 1e-05, %v505_v12  ;;  %v1352_v12 = vld [vmem:[%s1801_s13 + $0x20] sm:$0xff]  }
 0x148   : > { %1359 = vrsqrt.f32 %v506_v13  ;;  %v1353_v13 = vld [vmem:[%s1799_s11 + $0x28] sm:$0xff]  }
 0x152   : > { %v1360_v14 = vpop.eup %1359 }
 0x153   : > { %v508_v16 = vmul.f32 %v1360_v14, %v500_v4  ;;  %v1345_v4 = vld [vmem:[%s1799_s11 + $0x8] sm:$0xff]  }
 0x154   : > { %v1354_v14 = vld [vmem:[%s1801_s13 + $0x28] sm:$0xff]  }
 0x155   : > { %v515_v18 = vmul.f32 %v1153_v15, %v508_v16  ;;  %v671_v22 = vmul.f32 %v1163_v19, %v508_v16  ;;  %v1355_v15 = vld [vmem:[%s1799_s11 + $0x30] sm:$0xff]  }
 0x156   : > { %v1356_v16 = vld [vmem:[%s1801_s13 + $0x30] sm:$0xff]  }
 0x157   : > { %v522_v20 = vadd.f32 %v1154_v17, %v515_v18  ;;  %v678_v28 = vadd.f32 %v1164_v25, %v671_v22  ;;  %v1357_v17 = vld [vmem:[%s1799_s11 + $0x38] sm:$0xff]  }
 0x158   : > { %v1358_v18 = vld [vmem:[%s1801_s13 + $0x38] sm:$0xff]  }
 0x159   : > { %v523_v23 = vpack.c.bf16 %v522_v20, %v522_v20  ;;  %v679_v29 = vpack.c.bf16 %v678_v28, %v678_v28 }
 0x15b   : > { %1230 = vmatmul.mubr.msk.bf16.vlgmr.msra.gmra.mrb[0].mxu0 %vm494_vm0, %v523_v23 }
 0x15c   : > { %741 = vmatpush1.bf16.msra.mxu0 %v1333_v21  ;;  %772 = vmatprep.mubr.bf16.mxu0 %v1447_v27  ;;  %v700_v21 = vsub.s32 2, %v1638_v33 }
 0x15d   : > { %742 = vmatprep.subr.bf16.mxu0 %v1338_v24 }
 0x15e   : > { %v701_v24 = vrot.slane %v1647_v40, %v700_v21 }
 0x160   : > { %743 = vmatpush1.bf16.msra.mxu0 %v1336_v26 }
 0x161   : > { %1249 = vmatprep.subr.bf16.mxu0 %v1445_v8 }
 0x163   : > { %1171 = vmatmul.mubr.msk.bf16.vlgmr.msra.gmra.mrb[4].mxu0 %vm494_vm0, %v679_v29 }
 0x164   : > { %1265 = vmatprep.mubr.msk.bf16.mxu0 %vm1446_vm1, %v1445_v8  ;;  %1250 = vmatpush3.bf16.msra.mxu0 %v1343_v2 }
 0x165   : > { %1251 = vmatprep.subr.bf16.mxu0 %v1445_v8 }
 0x168   : > { %1252 = vmatpush3.bf16.msra.mxu0 %v1345_v4 }
 0x169   : > { %1253 = vmatprep.subr.bf16.mxu0 %v1445_v8 }
 0x16c   : > { %1254 = vmatpush3.bf16.msra.mxu0 %v1347_v6 }
 0x16d   : > { %1255 = vmatprep.subr.bf16.mxu0 %v1445_v8 }
 0x170   : > { %1256 = vmatpush3.bf16.msra.mxu0 %v1349_v9 }
 0x171   : > { %1257 = vmatprep.subr.bf16.mxu0 %v1445_v8 }
 0x174   : > { %1258 = vmatpush3.bf16.msra.mxu0 %v1351_v11 }
 0x175   : > { %1259 = vmatprep.subr.bf16.mxu0 %v1445_v8 }
 0x178   : > { %1260 = vmatpush3.bf16.msra.mxu0 %v1353_v13 }
 0x179   : > { %1261 = vmatprep.subr.bf16.mxu0 %v1445_v8 }
 0x17c   : > { %1262 = vmatpush3.bf16.msra.mxu0 %v1355_v15 }
 0x17d   : > { %1263 = vmatprep.subr.bf16.mxu0 %v1445_v8 }
 0x180   : > { %1264 = vmatpush3.bf16.msra.mxu0 %v1357_v17 }
 0x22e   : > { %v584_v35 = vpop.f32.mrb[0].mxu0 }
 0x22f   : > { %v585_v36 = vadd.f32 %v1155_v34, %v584_v35  ;;  %v1231_v37 = vpop.f32.mrb[1].mxu0 }
 0x230   : > { %v587_v39 = vpop.f32.mrb[2].mxu0 }
 0x231   : > { %v591_v41 = vmul.f32 0.70710677, %v585_v36  ;;  %v1232_v42 = vpop.f32.mrb[3].mxu0  ;;  %v590_v52 = vmul.f32 0.5, %v585_v36 }
 0x233   : > { %1361 = verf.f32 %v591_v41  ;;  %v1184_v41 = vld [vmem:[%s1802_s14] ss:$0 sm:$0xff] }
 0x236   : > { %v774_v44 = vpop.f32.mrb[4].mxu0 }
 0x237   : > { %v775_v45 = vadd.f32 %v774_v44, %v693_v43  ;;  %v776_v46 = vpop.f32.mrb[5].mxu0 }
 0x238   : > { %v778_v47 = vpop.f32.mrb[6].mxu0  ;;  %v777_v58 = vadd.f32 %v776_v46, %v697_v54  ;;  %v1159_v54 = vld [vmem:[%s1794_s6] ss:$0 sm:$0xff] }
 0x239   : > { %v1173_v48 = vmul.f32 -1.442695, %v775_v45  ;;  %v779_v49 = vpop.f32.mrb[7].mxu0 }
 0x23b   : > { %1363 = vpow2.f32 %v1173_v48 }
 0x23c   : > { %1365 = vtanh.f32 %v777_v58 }
 0x23d   : > { %v1362_v51 = vpop.eup %1361 }
 0x23e   : > { %v593_v53 = vadd.f32 1.0, %v1362_v51 }
 0x240   : > { %v594_v55 = vmul.f32 %v593_v53, %v590_v52 }
 0x242   : > { %v595_v57 = vpack.c.bf16 %v594_v55, %v594_v55  ;;  %v1175_v55 = vld [vmem:[%s1800_s12] ss:$0 sm:$0xff] }
 0x244   : > { %1238 = vmatmul.mubr.msk.bf16.vlgmr.msra.gmra.mrb[0].mxu1 %vm494_vm0, %v595_v57 }
 0x245   : > { %v1364_v59 = vpop.eup %1363  ;;  %1242 = vmatpush3.bf16.msra.mxu1 %v1341_v56  ;;  %1245 = vmatprep.mubr.msk.bf16.mxu1 %vm1446_vm1, %v1445_v8 }
 0x246   : > { %v824_v61 = vadd.f32 1.0, %v1364_v59  ;;  %1243 = vmatprep.subr.bf16.mxu1 %v1445_v8  ;;  %v1366_v62 = vpop.eup %1365 }
 0x248   : > { %1367 = vrcp.f32 %v824_v61 }
 0x249   : > { %1244 = vmatpush3.bf16.msra.mxu1 %v1342_v60 }
 0x24a   : > { %1269 = vmatprep.subr.bf16.mxu1 %v1445_v8 }
 0x24c   : > { %1246 = vmatmul.mubr.msk.bf16.vlgmr.msra.gmra.mrb[4].mxu1 %vm494_vm0, %v679_v29 }
 0x24d   : > { %1285 = vmatprep.mubr.msk.bf16.mxu1 %vm1446_vm1, %v1445_v8  ;;  %1270 = vmatpush3.bf16.msra.mxu1 %v1344_v3 }
 0x24e   : > { %1271 = vmatprep.subr.bf16.mxu1 %v1445_v8 }
 0x251   : > { %1272 = vmatpush3.bf16.msra.mxu1 %v1346_v5 }
 0x252   : > { %v1368_v63 = vpop.eup %1367  ;;  %1273 = vmatprep.subr.bf16.mxu1 %v1445_v8 }
 0x253   : > { %v834_v1 = vmul.f32 %v1368_v63, %v1366_v62 }
 0x255   : > { %1274 = vmatpush3.bf16.msra.mxu1 %v1348_v7 }
 0x256   : > { %1275 = vmatprep.subr.bf16.mxu1 %v1445_v8 }
 0x259   : > { %1276 = vmatpush3.bf16.msra.mxu1 %v1350_v10 }
 0x25a   : > { %1277 = vmatprep.subr.bf16.mxu1 %v1445_v8 }
 0x25d   : > { %1278 = vmatpush3.bf16.msra.mxu1 %v1352_v12 }
 0x25e   : > { %1279 = vmatprep.subr.bf16.mxu1 %v1445_v8 }
 0x261   : > { %1280 = vmatpush3.bf16.msra.mxu1 %v1354_v14 }
 0x262   : > { %1281 = vmatprep.subr.bf16.mxu1 %v1445_v8 }
 0x265   : > { %1282 = vmatpush3.bf16.msra.mxu1 %v1356_v16 }
 0x266   : > { %1283 = vmatprep.subr.bf16.mxu1 %v1445_v8 }
 0x269   : > { %1284 = vmatpush3.bf16.msra.mxu1 %v1358_v18 }
 0x317   : > { %v656_v19 = vpop.f32.mrb[0].mxu1 }
 0x318   : > { %v1239_v20 = vpop.f32.mrb[1].mxu1  ;;  %v657_v56 = vadd.f32 %v1159_v54, %v656_v19 }
 0x319   : > { %v659_v22 = vpop.f32.mrb[2].mxu1 }
 0x31a   : > { %v1240_v23 = vpop.f32.mrb[3].mxu1  ;;  %v662_v59 = vadd.f32 %v657_v56, %v1582_v0 }
 0x31f   : > { %v815_v25 = vpop.f32.mrb[4].mxu1 }
 0x320   : > { %v816_v26 = vadd.f32 %v815_v25, %v701_v24  ;;  %v1247_v27 = vpop.f32.mrb[5].mxu1 }
 0x321   : > { %v818_v28 = vpop.f32.mrb[6].mxu1 }
 0x322   : > { %v1174_v29 = vmul.f32 -1.442695, %v816_v26  ;;  %v1248_v30 = vpop.f32.mrb[7].mxu1 }
 0x324   : > { %1369 = vpow2.f32 %v1174_v29 }
 0x325   : > { %1371 = vtanh.f32 %v834_v1 }
 0x32e   : > { %v1370_v31 = vpop.eup %1369 }
 0x32f   : > { %v831_v32 = vadd.f32 1.0, %v1370_v31  ;;  %v1372_v8 = vpop.eup %1371 }
 0x331   : > { %1373 = vrcp.f32 %v831_v32 }
 0x33b   : > { %v1374_v34 = vpop.eup %1373 }
 0x33c   : > { %v836_v35 = vmul.f32 %v1374_v34, %v1372_v8 }
 0x33e   : > { %v838_v36 = vmul.f32 0.70710677, %v836_v35  ;;  %v837_v37 = vmul.f32 0.5, %v836_v35 }
 0x340   : > { %1375 = verf.f32 %v838_v36 }
 0x34a   : > { %v1376_v33 = vpop.eup %1375 }
 0x34b   : > { %v840_v38 = vadd.f32 1.0, %v1376_v33 }
 0x34d   : > { %v841_v39 = vmul.f32 %v840_v38, %v837_v37 }
 0x34f   : > { %v842_v40 = vpack.c.bf16 %v841_v39, %v841_v39 }
 0x351   : > { %1266 = vmatmul.mubr.bf16.vlgmr.msra.gmra.mrb[8].mxu0 %v842_v40  ;;  %1286 = vmatmul.mubr.bf16.vlgmr.msra.gmra.mrb[8].mxu1 %v842_v40 }
 0x424   : > { %v948_v42 = vpop.f32.mrb[8].mxu0  ;;  %v1059_v43 = vpop.f32.mrb[8].mxu1 }
 0x425   : > { %v1060_v44 = vadd.f32 %v1184_v41, %v1059_v43  ;;  %v1267_v45 = vpop.f32.mrb[9].mxu0  ;;  %v1287_v46 = vpop.f32.mrb[9].mxu1  ;;  %v949_v57 = vadd.f32 %v1175_v55, %v948_v42 }
 0x426   : > { %v951_v47 = vpop.f32.mrb[10].mxu0  ;;  %v1062_v48 = vpop.f32.mrb[10].mxu1 }
 0x427   : > { %v1193_v49 = vmul.f32 -1.442695, %v1060_v44  ;;  %v1268_v50 = vpop.f32.mrb[11].mxu0  ;;  %v1288_v51 = vpop.f32.mrb[11].mxu1 }
 0x429   : > { %1377 = vpow2.f32 %v1193_v49 }
 0x433   : > { %v1378_v52 = vpop.eup %1377 }
 0x434   : > { %v1068_v53 = vadd.f32 1.0, %v1378_v52 }
 0x436   : > { %1379 = vrcp.f32 %v1068_v53 }
 0x440   : > { %v1380_v58 = vpop.eup %1379 }
 0x441   : > { %v1071_v60 = vmul.f32 %v1380_v58, %v949_v57 }
 0x443   : > { %v1072_v61 = vadd.f32 %v1071_v60, %v662_v59 }
 0x445   : > { %1073 = vst.msk [vmem:[%s485_s17] sm:$0xff] %vm494_vm0, %v1072_v61 }
 0x446   : > { %1394 = shalt.err (!%p1391_p3)
}
 0x447   : > { %s1395_s2 = scalar_lea.hbm %s1745_s30, 128  ;;  %s1399_s17 = scalar_lea.hbm %s1803_s15, 256 }
 0x448   : > { %p1396_p4 = scmp.ne.s32.totalorder %s1745_s30, %s1395_s2  ;;  %p1400_p9 = scmp.lt.u32.totalorder %s1745_s30, %s1803_s15 }
 0x449   : > { %p1401_p10 = scmp.lt.u32.totalorder %s1399_s17, %s1395_s2  ;;  %p1403_p12 = scmp.lt.u32.totalorder %s1395_s2, %s1745_s30 }
 0x44a   : > { %p1397_p7 = pnand %p1396_p4, %p1567_p5 }
 0x44b   : > { %p1402_p11 = por %p1401_p10, %p1400_p9 }
 0x44c   : > { %p1398_p8 = pneg %p1397_p7 }
 0x44d   : > { %p1404_p13 = por %p1403_p12, %p1402_p11 }
 0x44f   : > { %p1405_p0 = pnand %p1404_p13, %p1398_p8 }
 0x451   : > { %1408 = shalt.err (!%p1405_p0)
}
 0x452   : > { %1289 = dma.vmem_to_hbm [thread:$0]  (%p1567_p5), %s1747_s23, 128, %s1745_s30, %s1075_s0  }
 0x453 PF: > { %p1295_p1 = scmp.ge.s32.totalorder %s1443_s21, 2  ;;  %s1100_s22 = sand.u32 1, %s1431_s18  }
 0x454   : > { %s1101_s1 = scalar_lea.sflag [#allocation3], %s1100_s22 }
 0x455   : > { %p1292_p2 = pnand %p1295_p1, %p1571_p6 }
 0x457   : > { %1426 = dma.done.wait (!%p1292_p2), %s1101_s1, 128  }
 0x458   : > { %1428 = vsyncadd (!%p1292_p2), %s1101_s1, 4294967168  ;;  %s1815_s27 = sld [smem:[#allocation5_spill]]  ;;  %p25_p3 = scmp.ge.s32.totalorder %s1554_s24, 4  }
 0x459   : > { %s1816_s18 = smov %s1435_s19  ;;  %s1817_s19 = smov %s1439_s20 }
 0x45a   : > { %s1819_s21 = smov %s1554_s24  ;;  %27 = sbr.rel (!%p25_p3) target bundleno = 8 (0x8), region = 115 }
 0x45e   : > { %s1818_s20 = smov %s1815_s27 }
 0x461   :  { %1106 = vsyncpa [#allocation3], 1 }
 0x462   :  { %1108 = vsyncpa [#allocation3 + $0x1], 1 }

</bundles_post_ra>
